<compile_context>
chip_gen: v7x
topology: tpu7x:2x2x1
jax: 0.10.0
libtpu: 0.0.40
codegen_flags: <defaults>
</compile_context>

<pallas_src>
import jax
import jax.numpy as jnp
import numpy as np
from jax.experimental import pallas as pl
from jax.experimental.pallas import tpu as pltpu


def _identity_copy_kernel(x_ref, o_ref):
    # Identity "embedding": copy the lane-dense (rows, lanes) tile through VMEM.
    o_ref[...] = x_ref[...]


# Widest lane width (multiple of 128) we try to fold the flattened tensor into.
_LANE_CANDIDATES = (4096, 2048, 1024, 512, 256, 128)
# Per-block byte budget. (in + out) x double-buffering = 4x this, which stays
# well inside the scoped-VMEM defaults on all generations (16 MiB v5e,
# 32 MiB v6e, 32/64 MiB v7x).
_MAX_BLOCK_BYTES = 2 * 1024 * 1024


@jax.jit
def base_embedding_forward(x: jax.Array) -> jax.Array:
    """Forward for the (abstract) BaseEmbedding: identity pass-through."""
    orig_shape = x.shape
    n = int(np.prod(orig_shape)) if orig_shape else 1
    itemsize = jnp.dtype(x.dtype).itemsize

    # Lane-dense view: pick the widest last dim (multiple of 128) that divides
    # the element count; otherwise fall back to the original last dim (the
    # full-dim block exemption keeps that legal too).
    lanes = next((c for c in _LANE_CANDIDATES if n % c == 0), None)
    if lanes is None:
        lanes = orig_shape[-1] if len(orig_shape) >= 1 else 1
    rows = n // lanes
    x2 = x.reshape(rows, lanes)

    # Row-block size: as many rows as fit the byte budget, a multiple of 8
    # (sublane) unless the block covers the whole leading dim.
    max_rows = max(8, (_MAX_BLOCK_BYTES // (lanes * itemsize)) // 8 * 8)
    block_rows = rows if rows <= max_rows else max_rows
    grid = (pl.cdiv(rows, block_rows),)

    out2 = pl.pallas_call(
        _identity_copy_kernel,
        out_shape=jax.ShapeDtypeStruct((rows, lanes), x.dtype),
        grid_spec=pltpu.PrefetchScalarGridSpec(
            num_scalar_prefetch=0,
            grid=grid,
            in_specs=[pl.BlockSpec((block_rows, lanes), lambda i: (i, 0))],
            out_specs=pl.BlockSpec((block_rows, lanes), lambda i: (i, 0)),
        ),
        # Identity: let the output reuse the input HBM allocation.
        input_output_aliases={0: 0},
        compiler_params=pltpu.CompilerParams(
            dimension_semantics=("parallel",),
            vmem_limit_bytes=32 * 1024 * 1024,
        ),
    )(x2)

    return out2.reshape(orig_shape)


if __name__ == "__main__":
    key = jax.random.PRNGKey(0)
    B, S, H = 2, 8, 32  # small shapes consistent with an embedding module
    x = jax.random.normal(key, (B, S, H), dtype=jnp.float32)

    # Host copy BEFORE the call: the kernel output aliases the input buffer.
    expected = np.asarray(x)

    out = base_embedding_forward(x)
    out = jax.block_until_ready(out)

    assert out.shape == (B, S, H)
    assert out.dtype == x.dtype
    assert np.allclose(np.asarray(out), expected), "identity pass-through mismatch"

    print("KERNEL_OK")
</pallas_src>

<mosaic_0001>
module attributes {stable_mosaic.version = 11 : i64} {
  func.func @_identity_copy_kernel(%arg0: i32, %arg1: memref<1x512xf32, #tpu.memory_space<vmem>>, %arg2: memref<1x512xf32, #tpu.memory_space<vmem>>) attributes {dimension_semantics = [#tpu.dimension_semantics<parallel>], iteration_bounds = array<i64: 1>, scalar_prefetch = 0 : i64, scratch_operands = 0 : i64, tpu.core_type = #tpu.core_type<tc>, window_params = [{transform_indices = @transform_0, window_bounds = array<i64: 1, 512>}, {transform_indices = @transform_1, window_bounds = array<i64: 1, 512>}]} {
    %c0 = arith.constant 0 : index
    %c0_0 = arith.constant 0 : index
    %0 = vector.load %arg1[%c0, %c0_0] : memref<1x512xf32, #tpu.memory_space<vmem>>, vector<1x512xf32>
    %c0_1 = arith.constant 0 : index
    %c0_2 = arith.constant 0 : index
    %1 = vector.load %arg2[%c0_1, %c0_2] : memref<1x512xf32, #tpu.memory_space<vmem>>, vector<1x512xf32>
    tpu.vector_store %arg2[%c0_1, %c0_2], %0 {strides = array<i32>} : memref<1x512xf32, #tpu.memory_space<vmem>>, vector<1x512xf32>,
    return
  }
  func.func @transform_0(%arg0: i32) -> (i32, i32) {
    %c0_i32 = arith.constant 0 : i32
    %c0_i32_0 = arith.constant 0 : i32
    return %arg0, %c0_i32 : i32, i32
  }
  func.func @transform_1(%arg0: i32) -> (i32, i32) {
    %c0_i32 = arith.constant 0 : i32
    %c0_i32_0 = arith.constant 0 : i32
    return %arg0, %c0_i32 : i32, i32
  }
}

</mosaic_0001>

<bundles_post_ra>
// kernel: base_embedding_forward.1
= control target key start
LH: loop header
LB: loop body
LE: loop exit
PB: predicated region body
PF: predicated region fallthrough
CT: control target
= control target key end

     0   :  { %v9_v0 = vlaneseq  ;;  %s34_s0 = inlined_call_operand.vmem [shape: f32[1,512], index: 0, kind: input, shape index: {}, may-alias: {0,1}]   ;;  %s35_s1 = inlined_call_operand.vmem [shape: f32[1,512], index: 1, kind: output, shape index: {}, may-alias: {0,1}]  }
   0x1   :  { %v8_v1 = vld [vmem:[%s34_s0] sm:$0xf] }
   0x2   :  { %vm11_vm0 = vcmp.lt.s32.totalorder %v9_v0, 512 }
   0x3   :  { %13 = vst.msk [vmem:[%s35_s1] sm:$0xf] %vm11_vm0, %v8_v1 }

</bundles_post_ra>
